<compile_context>
chip_gen: v7x
topology: tpu7x:2x2x1
jax: 0.10.0
libtpu: 0.0.40
codegen_flags: <defaults>
</compile_context>

<pallas_src>
import math

import jax
import jax.numpy as jnp
from jax.experimental import pallas as pl
from jax.experimental.pallas import tpu as pltpu


_PI = math.pi
_PI_2 = math.pi / 2.0
_PI_4 = math.pi / 4.0
_TAN_PI_8 = 0.4142135623730951   # tan(pi/8)

_LANES = 128
_SUBLANES = 8


def _round_up(x: int, m: int) -> int:
    return ((x + m - 1) // m) * m


def _on_left_kernel(xy_ref, out_ref):
    # xy_ref:  (4, tile_r, 128) f32, planes = [x1, y1, x2, y2]; the batch is
    #          folded into (rows, lanes) so every op runs on full (8,128) vregs.
    # out_ref: (tile_r, 128) f32, lane-dense (unmasked stores).
    x1 = xy_ref[0]
    y1 = xy_ref[1]
    x2 = xy_ref[2]
    y2 = xy_ref[3]
    dx = x1 - x2
    dy = y1 - y2

    ady = jnp.abs(dy)
    p = -dx                                   # > 0 exactly where result != 0
    a = jnp.minimum(ady, p)
    b = jnp.maximum(ady, p)

    # atan(a/b) on [0, pi/4] with a single reciprocal and no divide:
    #   a <= tan(pi/8)*b : atan(a/b) = P(a/b)
    #   otherwise        : atan(a/b) = pi/4 + P((a-b)/(a+b))
    # Both reduced arguments lie in [-tan(pi/8), tan(pi/8)].
    small = a <= jnp.float32(_TAN_PI_8) * b
    num = jnp.where(small, a, a - b)
    den = jnp.where(small, b, a + b)
    r = pl.reciprocal(den, approx=True)       # EUP slot (otherwise idle)
    r = r * (jnp.float32(2.0) - den * r)      # one Newton step -> ~f32 accuracy
    x = num * r
    z = x * x
    # Cephes atanf polynomial, valid for |x| <= tan(pi/8).
    poly = ((jnp.float32(8.05374449538e-2) * z
             - jnp.float32(1.38776856032e-1)) * z
            + jnp.float32(1.99777106478e-1)) * z - jnp.float32(3.33329491539e-1)
    atan_red = x + x * z * poly
    atan_ab = jnp.where(small, atan_red, jnp.float32(_PI_4) + atan_red)
    # atan(|dy| / (-dx)) in [0, pi/2]; garbage (inf/NaN) on dx >= 0 lanes and
    # zero-padded lanes is masked out by the final select.
    atan_t = jnp.where(ady > p, jnp.float32(_PI_2) - atan_ab, atan_ab)

    # result = 0.9 * (1 - (2/pi) * atan(|dy|/(-dx)))   where dx < 0, else 0.
    res = jnp.float32(0.9) - jnp.float32(1.8 / _PI) * atan_t
    out_ref[...] = jnp.where(dx < jnp.float32(0.0), res, jnp.float32(0.0))


def on_left(z_1, z_2, *, tile_elems: int = 65536):
    """Pallas equivalent of OnLeftValuationFunction.forward.

    Args:
      z_1, z_2: (B, D) object-centric representations; last two features are
        (X, Y).
      tile_elems: max batch elements processed per grid step (rounded so each
        step is a whole number of (8, 128) vregs).
    Returns:
      (B,) float32 probabilities in [0, 0.9].
    """
    assert z_1.shape == z_2.shape and z_1.ndim == 2
    B, D = z_1.shape
    z_1 = z_1.astype(jnp.float32)
    z_2 = z_2.astype(jnp.float32)

    # ---- tiling: batch folded to (rows, 128) lanes, rows tiled on the grid.
    rows_needed = -(-B // _LANES)
    target_rows = max(_SUBLANES, _round_up(max(tile_elems, _LANES) // _LANES,
                                           _SUBLANES))
    # Megacore (v7x has 2 TCs): keep >= 2 "parallel" grid steps when there is
    # enough work so both cores get a share.  On 1-TC chips the extra step
    # costs ~0.35 us, negligible at these tile sizes.
    if rows_needed > 2 * _SUBLANES:
        target_rows = min(target_rows,
                          _round_up(-(-rows_needed // 2), _SUBLANES))
    tile_r = min(target_rows, _round_up(rows_needed, _SUBLANES))
    rows = _round_up(rows_needed, tile_r)
    b_pad = rows * _LANES

    # ---- wrapper-side coordinate extraction (SoA slab, batch on lanes).
    # TODO(synk): drop this gather/pad/reshape once upstream stores coordinates
    #             in SoA layout; it is the only extra HBM round-trip left.
    xy = jnp.stack(
        [z_1[:, D - 2], z_1[:, D - 1], z_2[:, D - 2], z_2[:, D - 1]], axis=0)
    if b_pad != B:
        xy = jnp.pad(xy, ((0, 0), (0, b_pad - B)))
    xy = xy.reshape(4, rows, _LANES)

    out = pl.pallas_call(
        _on_left_kernel,
        out_shape=jax.ShapeDtypeStruct((rows, _LANES), jnp.float32),
        grid=(rows // tile_r,),
        in_specs=[pl.BlockSpec((4, tile_r, _LANES), lambda i: (0, i, 0))],
        out_specs=pl.BlockSpec((tile_r, _LANES), lambda i: (i, 0)),
        compiler_params=pltpu.CompilerParams(
            dimension_semantics=("parallel",)),
    )(xy)
    return out.reshape(b_pad)[:B]


def _reference_on_left(z_1, z_2):
    """Plain-JAX mirror of the torch forward (uses jnp.arctan2)."""
    c_1 = z_1[:, -2:]
    c_2 = z_2[:, -2:]
    x = c_1[:, 0] - c_2[:, 0]
    y = c_1[:, 1] - c_2[:, 1]
    degree = jnp.arctan2(y, x) / jnp.pi * 180.0
    probs = (jnp.abs(degree) - 90.0) / 90.0
    return jnp.where((degree <= -90.0) | (degree >= 90.0),
                     probs * 0.9, 0.0).astype(jnp.float32)


if __name__ == "__main__":
    key = jax.random.PRNGKey(0)
    D = 9  # [agent, key, door, blue, green, red, got_key, X, Y]

    # (B, tile_elems): tiny default case, a padded single-tile case, and a
    # multi-step grid case (forces padding + >= 2 parallel steps).
    for B, tile_elems in ((2, 65536), (300, 65536), (2500, 1024)):
        k1, k2 = jax.random.split(jax.random.fold_in(key, B))
        z_1 = jax.random.uniform(k1, (B, D), dtype=jnp.float32) * 4.0
        z_2 = jax.random.uniform(k2, (B, D), dtype=jnp.float32) * 4.0

        result = on_left(z_1, z_2, tile_elems=tile_elems)
        jax.block_until_ready(result)

        ref = _reference_on_left(z_1, z_2)
        assert result.shape == (B,)
        assert result.dtype == jnp.float32
        assert jnp.allclose(result, ref, atol=1e-5), (
            B, float(jnp.max(jnp.abs(result - ref))))

    print("KERNEL_OK")
</pallas_src>

<mosaic_0001>
module attributes {stable_mosaic.version = 11 : i64} {
  func.func @_on_left_kernel(%arg0: i32, %arg1: memref<4x8x128xf32, #tpu.memory_space<vmem>>, %arg2: memref<8x128xf32, #tpu.memory_space<vmem>>) attributes {dimension_semantics = [#tpu.dimension_semantics<parallel>], iteration_bounds = array<i64: 1>, scalar_prefetch = 0 : i64, scratch_operands = 0 : i64, tpu.core_type = #tpu.core_type<tc>, window_params = [{transform_indices = @transform_0, window_bounds = array<i64: 4, 8, 128>}, {transform_indices = @transform_1, window_bounds = array<i64: 8, 128>}]} {
    %c0 = arith.constant 0 : index
    %c0_0 = arith.constant 0 : index
    %c0_1 = arith.constant 0 : index
    %0 = vector.load %arg1[%c0, %c0_0, %c0_1] : memref<4x8x128xf32, #tpu.memory_space<vmem>>, vector<1x8x128xf32>
    %1 = vector.shape_cast %0 : vector<1x8x128xf32> to vector<8x128xf32>
    %c1 = arith.constant 1 : index
    %c0_2 = arith.constant 0 : index
    %c0_3 = arith.constant 0 : index
    %2 = vector.load %arg1[%c1, %c0_2, %c0_3] : memref<4x8x128xf32, #tpu.memory_space<vmem>>, vector<1x8x128xf32>
    %3 = vector.shape_cast %2 : vector<1x8x128xf32> to vector<8x128xf32>
    %c2 = arith.constant 2 : index
    %c0_4 = arith.constant 0 : index
    %c0_5 = arith.constant 0 : index
    %4 = vector.load %arg1[%c2, %c0_4, %c0_5] : memref<4x8x128xf32, #tpu.memory_space<vmem>>, vector<1x8x128xf32>
    %5 = vector.shape_cast %4 : vector<1x8x128xf32> to vector<8x128xf32>
    %c3 = arith.constant 3 : index
    %c0_6 = arith.constant 0 : index
    %c0_7 = arith.constant 0 : index
    %6 = vector.load %arg1[%c3, %c0_6, %c0_7] : memref<4x8x128xf32, #tpu.memory_space<vmem>>, vector<1x8x128xf32>
    %7 = vector.shape_cast %6 : vector<1x8x128xf32> to vector<8x128xf32>
    %8 = arith.subf %1, %5 : vector<8x128xf32>
    %9 = arith.subf %3, %7 : vector<8x128xf32>
    %10 = math.absf %9 : vector<8x128xf32>
    %cst = arith.constant 0.000000e+00 : f32
    %11 = vector.broadcast %cst : f32 to vector<8x128xf32>
    %12 = arith.subf %11, %8 : vector<8x128xf32>
    %13 = arith.minimumf %10, %12 : vector<8x128xf32>
    %14 = arith.maximumf %10, %12 : vector<8x128xf32>
    %cst_8 = arith.constant 0.414213568 : f32
    %15 = vector.broadcast %cst_8 : f32 to vector<8x128xf32>
    %16 = arith.mulf %15, %14 : vector<8x128xf32>
    %17 = arith.cmpf ole, %13, %16 : vector<8x128xf32>
    %18 = arith.subf %13, %14 : vector<8x128xf32>
    %19 = arith.select %17, %13, %18 : vector<8x128xi1>, vector<8x128xf32>
    %20 = arith.addf %13, %14 : vector<8x128xf32>
    %21 = arith.select %17, %14, %20 : vector<8x128xi1>, vector<8x128xf32>
    %22 = tpu.reciprocal %21 {approx = true} : vector<8x128xf32> -> vector<8x128xf32>
    %23 = arith.mulf %21, %22 : vector<8x128xf32>
    %cst_9 = arith.constant 2.000000e+00 : f32
    %24 = vector.broadcast %cst_9 : f32 to vector<8x128xf32>
    %25 = arith.subf %24, %23 : vector<8x128xf32>
    %26 = arith.mulf %22, %25 : vector<8x128xf32>
    %27 = arith.mulf %19, %26 : vector<8x128xf32>
    %28 = arith.mulf %27, %27 : vector<8x128xf32>
    %cst_10 = arith.constant 0.0805374458 : f32
    %29 = vector.broadcast %cst_10 : f32 to vector<8x128xf32>
    %30 = arith.mulf %29, %28 : vector<8x128xf32>
    %cst_11 = arith.constant 0.138776854 : f32
    %31 = vector.broadcast %cst_11 : f32 to vector<8x128xf32>
    %32 = arith.subf %30, %31 : vector<8x128xf32>
    %33 = arith.mulf %32, %28 : vector<8x128xf32>
    %cst_12 = arith.constant 0.199777111 : f32
    %34 = vector.broadcast %cst_12 : f32 to vector<8x128xf32>
    %35 = arith.addf %33, %34 : vector<8x128xf32>
    %36 = arith.mulf %35, %28 : vector<8x128xf32>
    %cst_13 = arith.constant 0.333329499 : f32
    %37 = vector.broadcast %cst_13 : f32 to vector<8x128xf32>
    %38 = arith.subf %36, %37 : vector<8x128xf32>
    %39 = arith.mulf %27, %28 : vector<8x128xf32>
    %40 = arith.mulf %39, %38 : vector<8x128xf32>
    %41 = arith.addf %27, %40 : vector<8x128xf32>
    %cst_14 = arith.constant 0.785398185 : f32
    %42 = vector.broadcast %cst_14 : f32 to vector<8x128xf32>
    %43 = arith.addf %42, %41 : vector<8x128xf32>
    %44 = arith.select %17, %41, %43 : vector<8x128xi1>, vector<8x128xf32>
    %45 = arith.cmpf ogt, %10, %12 : vector<8x128xf32>
    %cst_15 = arith.constant 1.57079637 : f32
    %46 = vector.broadcast %cst_15 : f32 to vector<8x128xf32>
    %47 = arith.subf %46, %44 : vector<8x128xf32>
    %48 = arith.select %45, %47, %44 : vector<8x128xi1>, vector<8x128xf32>
    %cst_16 = arith.constant 0.572957814 : f32
    %49 = vector.broadcast %cst_16 : f32 to vector<8x128xf32>
    %50 = arith.mulf %49, %48 : vector<8x128xf32>
    %cst_17 = arith.constant 0.899999976 : f32
    %51 = vector.broadcast %cst_17 : f32 to vector<8x128xf32>
    %52 = arith.subf %51, %50 : vector<8x128xf32>
    %cst_18 = arith.constant 0.000000e+00 : f32
    %53 = vector.broadcast %cst_18 : f32 to vector<8x128xf32>
    %54 = arith.cmpf olt, %8, %53 : vector<8x128xf32>
    %cst_19 = arith.constant 0.000000e+00 : f32
    %55 = vector.broadcast %cst_19 : f32 to vector<8x128xf32>
    %56 = arith.select %54, %52, %55 : vector<8x128xi1>, vector<8x128xf32>
    %c0_20 = arith.constant 0 : index
    %c0_21 = arith.constant 0 : index
    %57 = vector.load %arg2[%c0_20, %c0_21] : memref<8x128xf32, #tpu.memory_space<vmem>>, vector<8x128xf32>
    tpu.vector_store %arg2[%c0_20, %c0_21], %56 {strides = array<i32>} : memref<8x128xf32, #tpu.memory_space<vmem>>, vector<8x128xf32>,
    return
  }
  func.func @transform_0(%arg0: i32) -> (i32, i32, i32) {
    %c0_i32 = arith.constant 0 : i32
    %c0_i32_0 = arith.constant 0 : i32
    %c0_i32_1 = arith.constant 0 : i32
    return %c0_i32, %arg0, %c0_i32_0 : i32, i32, i32
  }
  func.func @transform_1(%arg0: i32) -> (i32, i32) {
    %c0_i32 = arith.constant 0 : i32
    %c0_i32_0 = arith.constant 0 : i32
    return %arg0, %c0_i32 : i32, i32
  }
}

</mosaic_0001>

<bundles_post_ra>
// kernel: tpu_custom_call.1
= control target key start
LH: loop header
LB: loop body
LE: loop exit
PB: predicated region body
PF: predicated region fallthrough
CT: control target
= control target key end

     0   :  { %6 = vsyncpa [#allocation3], 0  ;;  %s179_s0 = inlined_call_operand.hbm [shape: f32[4,8,128], index: 0, kind: input, shape index: {}]   ;;  %s180_s1 = inlined_call_operand.hbm [shape: f32[8,128], index: 1, kind: output, shape index: {}]  }
   0x1   :  { %7 = vsyncpa [#allocation4], 0  ;;  %s138_s6 = smov [#allocation2]   ;;  %s90_s10 = scalar_lea.hbm %s179_s0, 512 }
   0x2   :  { %s13_s7 = sshll.u32 %s138_s6, 4  ;;  %p91_p0 = scmp.ne.s32.totalorder %s179_s0, %s90_s10  ;;  %s14_s7 = int_to_ptr.vmem [resolvable:$true] %s13_s7 }
   0x3   :  { %p94_p1 = scmp.lt.u32.totalorder %s90_s10, %s179_s0 }
   0x5   :  { %p96_p2 = pnand %p94_p1, %p91_p0 }
   0x7   :  { %99 = shalt.err (!%p96_p2)
}
   0x8   :  { %s100_s15 = scalar_lea.vmem %s14_s7, 512  ;;  %p105_p4 = scmp.lt.s32.totalorder %s14_s7, %s14_s7 }
   0x9   :  { %p101_p3 = scmp.ne.s32.totalorder %s14_s7, %s100_s15  ;;  %p106_p5 = scmp.lt.s32.totalorder %s100_s15, %s100_s15 }
   0xb   :  { %p107_p6 = por %p106_p5, %p105_p4 }
   0xd   :  { %p108_p7 = pnand %p107_p6, %p101_p3 }
   0xf   :  { %111 = shalt.err (!%p108_p7)
}
  0x10   :  { %s139_s16 = smov 128   ;;  %s140_s17 = smov 8  }
  0x11   :  { %19 = dma.hbm_to_vmem [thread:$0]  %s179_s0, 512, %s14_s7, [#allocation3], %s139_s16, %s139_s16, %s140_s17  }
  0x12   :  { %134 = dma.done.wait [#allocation3], 512  }
  0x13   :  { %135 = vsyncadd [#allocation3], 4294966784  ;;  %v23_v0 = vld [vmem:[#allocation2] sm:$0xff]  ;;  %v25_v1 = vld [vmem:[#allocation2 + $0x8] sm:$0xff]  ;;  %s141_s0 = smov [#allocation5]  }
  0x14   :  { %v27_v2 = vld [vmem:[#allocation2 + $0x10] sm:$0xff]  ;;  %v29_v3 = vld [vmem:[#allocation2 + $0x18] sm:$0xff]  ;;  %s73_s20 = sshll.u32 %s141_s0, 4  ;;  %s74_s20 = int_to_ptr.vmem [resolvable:$true] %s73_s20 }
  0x15   :  { %v30_v4 = vsub.f32 %v23_v0, %v27_v2  ;;  %v31_v5 = vsub.f32 %v25_v1, %v29_v3  ;;  %s112_s21 = scalar_lea.vmem %s74_s20, 128  ;;  %p117_p9 = scmp.lt.s32.totalorder %s74_s20, %s74_s20 }
  0x16   :  { %p113_p8 = scmp.ne.s32.totalorder %s74_s20, %s112_s21  ;;  %p118_p10 = scmp.lt.s32.totalorder %s112_s21, %s112_s21 }
  0x17   :  { %v33_v6 = vsub.f32 0.0, %v30_v4  ;;  %v32_v7 = vand.u32 2147483647, %v31_v5  ;;  %vm64_vm2 = vcmp.lt.f32.partialorder %v30_v4, 0.0 }
  0x18   :  { %p119_p11 = por %p118_p10, %p117_p9 }
  0x19   :  { %v34_v8 = vmin.f32 %v32_v7, %v33_v6  ;;  %v35_v9 = vmax.f32 %v32_v7, %v33_v6  ;;  %vm59_vm1 = vcmp.gt.f32.partialorder %v32_v7, %v33_v6 }
  0x1a   :  { %p120_p12 = pnand %p119_p11, %p113_p8 }
  0x1b   :  { %v36_v10 = vmul.f32 0.41421357, %v35_v9  ;;  %v40_v11 = vadd.f32 %v35_v9, %v34_v8  ;;  %v38_v14 = vsub.f32 %v34_v8, %v35_v9 }
  0x1d   :  { %vm37_vm0 = vcmp.le.f32.partialorder %v34_v8, %v36_v10 }
  0x1e   :  { %v41_v12 = vsel %vm37_vm0, %v35_v9, %v40_v11  ;;  %v39_v17 = vsel %vm37_vm0, %v34_v8, %v38_v14 }
  0x1f   :  { %88 = vrcp.f32 %v41_v12 }
  0x29   :  { %v89_v13 = vpop.eup %88 }
  0x2a   :  { %v43_v15 = vmul.f32 %v89_v13, %v41_v12 }
  0x2c   :  { %v44_v16 = vsub.f32 2.0, %v43_v15 }
  0x2e   :  { %v45_v18 = vmul.f32 %v89_v13, %v44_v16 }
  0x30   :  { %v46_v19 = vmul.f32 %v45_v18, %v39_v17 }
  0x32   :  { %v47_v20 = vmul.f32 %v46_v19, %v46_v19 }
  0x34   :  { %v48_v21 = vmul.f32 0.080537446, %v47_v20  ;;  %v54_v26 = vmul.f32 %v47_v20, %v46_v19 }
  0x36   :  { %v82_v22 = vadd.f32 -0.13877685, %v48_v21 }
  0x38   :  { %v50_v23 = vmul.f32 %v82_v22, %v47_v20 }
  0x3a   :  { %v51_v24 = vadd.f32 0.19977711, %v50_v23 }
  0x3c   :  { %v52_v25 = vmul.f32 %v51_v24, %v47_v20 }
  0x3e   :  { %v83_v27 = vadd.f32 -0.3333295, %v52_v25 }
  0x40   :  { %v55_v28 = vmul.f32 %v83_v27, %v54_v26 }
  0x42   :  { %v56_v29 = vadd.f32 %v55_v28, %v46_v19 }
  0x44   :  { %v57_v30 = vadd.f32 0.7853982, %v56_v29 }
  0x46   :  { %v58_v31 = vsel %vm37_vm0, %v56_v29, %v57_v30 }
  0x47   :  { %v60_v32 = vsub.f32 1.5707964, %v58_v31 }
  0x49   :  { %v61_v33 = vsel %vm59_vm1, %v60_v32, %v58_v31 }
  0x4a   :  { %v62_v34 = vmul.f32 0.5729578, %v61_v33 }
  0x4c   :  { %v63_v35 = vsub.f32 0.9, %v62_v34 }
  0x4e   :  { %v65_v36 = vsel %vm64_vm2, %v63_v35, 0.0 }
  0x4f   :  { %66 = vst [vmem:[#allocation5] sm:$0xff] %v65_v36 }
  0x50   :  { %123 = shalt.err (!%p120_p12)
}
  0x51   :  { %s124_s24 = scalar_lea.hbm %s180_s1, 128 }
  0x52   :  { %p125_p13 = scmp.ne.s32.totalorder %s180_s1, %s124_s24  ;;  %p128_p0 = scmp.lt.u32.totalorder %s124_s24, %s180_s1 }
  0x54   :  { %p130_p1 = pnand %p128_p0, %p125_p13 }
  0x56   :  { %133 = shalt.err (!%p130_p1)
}
  0x57   :  { %76 = dma.vmem_to_hbm [thread:$0]  %s74_s20, 128, %s180_s1, [#allocation4]  }
  0x58   :  { %136 = dma.done.wait [#allocation4], 128  }
  0x59   :  { %137 = vsyncadd [#allocation4], 4294967168 }
  0x5a   :  { %80 = vsyncpa [#allocation3], 1 }
  0x5b   :  { %81 = vsyncpa [#allocation4], 1 }

</bundles_post_ra>
